<compile_context>
chip_gen: v7x
topology: tpu7x:2x2x1
jax: 0.10.0
libtpu: 0.0.40
codegen_flags: <defaults>
</compile_context>

<pallas_src>
import functools

import jax
import jax.numpy as jnp
from jax.experimental import pallas as pl
from jax.experimental.pallas import tpu as pltpu

MiB = 1024 * 1024


def _round_up(x, m):
    return ((x + m - 1) // m) * m


def _usable_vmem_bytes():
    """Generation-aware usable VMEM (with headroom for compiler scratch)."""
    cap = 64 * MiB  # conservative default: v7x per-TensorCore VMEM
    try:
        cap = int(pltpu.get_tpu_info().vmem_capacity_bytes)
    except Exception:
        try:
            kind = jax.devices()[0].device_kind.lower()
            if ("v4" in kind) or ("v5" in kind) or ("v6" in kind):
                cap = 128 * MiB
        except Exception:
            pass
    try:
        kind = jax.devices()[0].device_kind.lower()
        if "v7" in kind:
            cap = min(cap, 64 * MiB)  # 64 MiB per TensorCore on v7x
    except Exception:
        pass
    return int(cap * 0.85)


def fused_gcn_kernel(ahat_ref, x_hbm_ref, w_ref, b_ref, out_ref,
                     h_ref, sem_ref, *rest, num_layers, tile_m,
                     valid_classes, ahat_resident):
    """Fused multi-layer GCN forward.

    Grid = (num_layers, num_row_tiles); the layer axis is outermost and strictly
    sequential.  h_ref is a (2, n_pad, c_pad) bf16 ping-pong scratch holding the
    full current-layer activations.  Each grid step computes a tile_m-row slab
        z = (Ahat_slab @ H) @ W_l + b_l
    ReLU for hidden layers (written to the other ping-pong slot), masked
    log_softmax over the real class columns for the final layer (written to out).

    If `ahat_resident`, rest[0] is a VMEM scratch holding the whole normalized
    adjacency (filled by a single DMA at the first grid step); otherwise Ahat
    arrives as a pipelined (tile_m, n_pad) VMEM slab.
    """
    l = pl.program_id(0)
    r = pl.program_id(1)
    cur = l % 2          # ping-pong slot holding this layer's input activations
    nxt = 1 - cur        # slot receiving this layer's output activations
    row = pl.multiple_of(r * tile_m, tile_m)

    # First grid step: one-time DMAs from HBM (features -> slot 0, Ahat -> VMEM).
    @pl.when((l == 0) & (r == 0))
    def _():
        x_cp = pltpu.make_async_copy(x_hbm_ref, h_ref.at[0], sem_ref.at[0])
        x_cp.start()
        if ahat_resident:
            a_cp = pltpu.make_async_copy(ahat_ref, rest[0], sem_ref.at[1])
            a_cp.start()
        x_cp.wait()
        if ahat_resident:
            a_cp.wait()

    if ahat_resident:
        a_slab = rest[0][pl.ds(row, tile_m), :]     # (tile_m, n_pad) bf16, from VMEM
    else:
        a_slab = ahat_ref[...]                      # streamed (tile_m, n_pad) slab

    h_cur = h_ref[cur]                              # (n_pad, c_pad) bf16

    # Aggregate-then-transform: (Ahat_slab @ H) @ W_l + b_l, f32 MXU accumulation.
    agg = jnp.dot(a_slab, h_cur, preferred_element_type=jnp.float32)
    z = jnp.dot(agg.astype(jnp.bfloat16), w_ref[...],
                preferred_element_type=jnp.float32) + b_ref[...]

    # Hidden layers: ReLU, store bf16 activations into the other ping-pong slot.
    @pl.when(l < num_layers - 1)
    def _():
        h_ref[nxt, pl.ds(row, tile_m), :] = (
            jnp.maximum(z, 0.0).astype(jnp.bfloat16))

    # Final layer: numerically stable log_softmax over the real class columns.
    # Padded lane columns are masked to a large negative so they cannot
    # contaminate the normalization; the store stays 128-lane dense and the
    # wrapper slices the (N, num_classes) log-probabilities out afterwards.
    @pl.when(l == num_layers - 1)
    def _():
        lane = jax.lax.broadcasted_iota(jnp.int32, z.shape, dimension=1)
        zm = jnp.where(lane < valid_classes, z, -1e30)
        m = jnp.max(zm, axis=-1, keepdims=True)
        lse = m + jnp.log(jnp.sum(jnp.exp(zm - m), axis=-1, keepdims=True))
        out_ref[...] = (zm - lse).astype(out_ref.dtype)


def gnn_vertex_cover_forward(x, ahat, weights, biases):
    """Mirrors GNNVertexCover.forward: ReLU after all but the last GCN layer,
    log_softmax(dim=1) after the last one.  Returns (N, num_classes) f32."""
    n, c_in = x.shape
    num_layers = len(weights)
    num_classes = weights[-1].shape[1]
    widest = max([c_in] + [w.shape[1] for w in weights])

    # Lane-dense channel width and 128-aligned row/adjacency padding.
    c_pad = _round_up(max(widest, 128), 128)
    if n <= 512:
        n_pad = _round_up(n, 128)
        tile_m = n_pad
    else:
        n_pad = _round_up(n, 512)
        tile_m = 512   # v5e/v6e large-N default; shrunk below if VMEM-tight

    usable = _usable_vmem_bytes()
    margin = 2 * MiB  # compiler-internal scratch / semaphores

    def vmem_need(tm, resident):
        need = 2 * n_pad * c_pad * 2           # ping-pong activation scratch (bf16)
        need += 2 * c_pad * c_pad * 2          # W_l, double-buffered (bf16)
        need += 2 * 1 * c_pad * 4              # b_l, double-buffered (f32)
        need += 2 * tm * c_pad * 4             # output slab, double-buffered (f32)
        if resident:
            need += n_pad * n_pad * 2          # resident Ahat scratch (bf16, 1x)
        else:
            need += 2 * tm * n_pad * 2         # streamed Ahat slab, double-buffered
        return need

    ahat_resident = vmem_need(tile_m, True) + margin <= usable
    if not ahat_resident:
        # Streamed fallback for huge graphs; shrink row slabs if even the
        # double-buffered slab doesn't fit (keeps tile_m | n_pad).
        # (int8/fp8 Ahat would halve this stream; kept bf16 for accuracy here.)
        while tile_m > 256 and vmem_need(tile_m, False) + margin > usable:
            tile_m //= 2
    num_row_tiles = n_pad // tile_m
    vmem_limit = int(min(usable,
                         max(vmem_need(tile_m, ahat_resident) + margin, 32 * MiB)))

    # ---- pad / cast operands (plain JAX glue) ----
    ahat_p = jnp.zeros((n_pad, n_pad), jnp.bfloat16).at[:n, :n].set(
        ahat.astype(jnp.bfloat16))
    x_p = jnp.zeros((n_pad, c_pad), jnp.bfloat16).at[:n, :c_in].set(
        x.astype(jnp.bfloat16))
    w_stack = jnp.zeros((num_layers, c_pad, c_pad), jnp.bfloat16)
    b_stack = jnp.zeros((num_layers, 1, c_pad), jnp.float32)
    for i, (w, b) in enumerate(zip(weights, biases)):
        ci, co = w.shape
        w_stack = w_stack.at[i, :ci, :co].set(w.astype(jnp.bfloat16))
        b_stack = b_stack.at[i, 0, :co].set(b.reshape(-1).astype(jnp.float32))

    last = num_layers - 1
    if ahat_resident:
        ahat_spec = pl.BlockSpec(memory_space=pl.ANY)                 # HBM, DMA'd once
    else:
        ahat_spec = pl.BlockSpec((tile_m, n_pad), lambda l, r: (r, 0))  # streamed slab

    in_specs = [
        ahat_spec,
        pl.BlockSpec(memory_space=pl.ANY),                            # X (HBM, DMA'd once)
        pl.BlockSpec((None, c_pad, c_pad), lambda l, r: (l, 0, 0)),   # W_l
        pl.BlockSpec((None, 1, c_pad), lambda l, r: (l, 0, 0)),       # b_l
    ]
    # Output block index only advances during the final layer -> no stale
    # writebacks while hidden layers run.
    out_spec = pl.BlockSpec((tile_m, c_pad),
                            lambda l, r: (jnp.where(l == last, r, 0), 0))

    scratch_shapes = [
        pltpu.VMEM((2, n_pad, c_pad), jnp.bfloat16),   # ping-pong activations
        pltpu.SemaphoreType.DMA((2,)),                 # one-time staging DMAs
    ]
    if ahat_resident:
        scratch_shapes.append(pltpu.VMEM((n_pad, n_pad), jnp.bfloat16))

    kernel = functools.partial(
        fused_gcn_kernel, num_layers=num_layers, tile_m=tile_m,
        valid_classes=num_classes, ahat_resident=ahat_resident)

    out_p = pl.pallas_call(
        kernel,
        out_shape=jax.ShapeDtypeStruct((n_pad, c_pad), jnp.float32),
        grid_spec=pltpu.PrefetchScalarGridSpec(
            num_scalar_prefetch=0,
            grid=(num_layers, num_row_tiles),
            in_specs=in_specs,
            out_specs=out_spec,
            scratch_shapes=scratch_shapes,
        ),
        compiler_params=pltpu.CompilerParams(
            # Both axes must stay sequential: every row tile of layer l writes
            # the shared VMEM activation scratch that layer l+1 reads.
            # (v7x dual-TensorCore sharding of the row axis would need core_map
            # + per-layer core_barrier; deferred -- bandwidth fixes come first.)
            dimension_semantics=("arbitrary", "arbitrary"),
            vmem_limit_bytes=vmem_limit,
        ),
    )(ahat_p, x_p, w_stack, b_stack)

    return out_p[:n, :num_classes]


def build_normalized_adjacency(edge_index, num_nodes):
    """Dense D^{-1/2}(A+I)D^{-1/2}, matching GCNConv's default normalization."""
    a = jnp.zeros((num_nodes, num_nodes), jnp.float32)
    a = a.at[edge_index[0], edge_index[1]].set(1.0)
    a = jnp.maximum(a, a.T)                        # treat graph as undirected
    a = a + jnp.eye(num_nodes, dtype=jnp.float32)  # add self-loops
    deg = jnp.sum(a, axis=1)
    d_inv_sqrt = 1.0 / jnp.sqrt(deg)
    return d_inv_sqrt[:, None] * a * d_inv_sqrt[None, :]


def init_params(key, in_channels, hidden_channels, num_layers=3):
    """Deterministic glorot-uniform weights, zero biases (GCNConv defaults)."""
    dims = [in_channels] + [hidden_channels] * (num_layers - 1) + [2]
    weights, biases = [], []
    for i in range(num_layers):
        key, sub = jax.random.split(key)
        fan_in, fan_out = dims[i], dims[i + 1]
        limit = jnp.sqrt(6.0 / (fan_in + fan_out))
        w = jax.random.uniform(sub, (fan_in, fan_out), jnp.float32, -limit, limit)
        b = jnp.zeros((1, fan_out), jnp.float32)
        weights.append(w)
        biases.append(b)
    return weights, biases


def reference_forward(x, ahat, weights, biases):
    """Plain-JAX f32 reference of GNNVertexCover.forward."""
    h = x
    for i, (w, b) in enumerate(zip(weights, biases)):
        h = ahat @ (h @ w) + b
        if i < len(weights) - 1:
            h = jnp.maximum(h, 0.0)
    m = jnp.max(h, axis=1, keepdims=True)
    return h - m - jnp.log(jnp.sum(jnp.exp(h - m), axis=1, keepdims=True))


if __name__ == "__main__":
    key = jax.random.PRNGKey(0)

    num_nodes = 16
    in_channels = 4
    hidden_channels = 32
    num_layers = 3
    num_edges = 24

    k_x, k_src, k_dst, k_params = jax.random.split(key, 4)

    # node features [N, C_in]
    x = jax.random.normal(k_x, (num_nodes, in_channels), jnp.float32)

    # random edge_index [2, E]
    src = jax.random.randint(k_src, (num_edges,), 0, num_nodes)
    dst = jax.random.randint(k_dst, (num_edges,), 0, num_nodes)
    edge_index = jnp.stack([src, dst], axis=0)

    ahat = build_normalized_adjacency(edge_index, num_nodes)
    weights, biases = init_params(k_params, in_channels, hidden_channels, num_layers)

    out = gnn_vertex_cover_forward(x, ahat, weights, biases)
    out = jax.block_until_ready(out)

    assert out.shape == (num_nodes, 2)
    # rows of log_softmax should exp-sum to 1
    assert jnp.allclose(jnp.sum(jnp.exp(out), axis=1), 1.0, atol=1e-3)
    # agree with f32 reference within bf16 tolerance
    ref = reference_forward(x, ahat, weights, biases)
    assert jnp.allclose(out, ref, atol=1e-1), float(jnp.max(jnp.abs(out - ref)))

    print("KERNEL_OK")
</pallas_src>

<mosaic_0001>
module attributes {stable_mosaic.version = 11 : i64} {
  func.func @fused_gcn_kernel(%arg0: i32, %arg1: i32, %arg2: memref<128x128xbf16, #tpu.memory_space<any>>, %arg3: memref<128x128xbf16, #tpu.memory_space<any>>, %arg4: memref<1x128x128xbf16, #tpu.memory_space<vmem>>, %arg5: memref<1x1x128xf32, #tpu.memory_space<vmem>>, %arg6: memref<128x128xf32, #tpu.memory_space<vmem>>, %arg7: memref<2x128x128xbf16, #tpu.memory_space<vmem>>, %arg8: memref<2x!tpu.dma_semaphore, #tpu.memory_space<semaphore_mem>>, %arg9: memref<128x128xbf16, #tpu.memory_space<vmem>>) attributes {dimension_semantics = [#tpu.dimension_semantics<arbitrary>, #tpu.dimension_semantics<arbitrary>], iteration_bounds = array<i64: 3, 1>, scalar_prefetch = 0 : i64, scratch_operands = 3 : i64, tpu.core_type = #tpu.core_type<tc>, window_params = [{}, {}, {transform_indices = @transform_2, window_bounds = array<i64: 1, 128, 128>}, {transform_indices = @transform_3, window_bounds = array<i64: 1, 1, 128>}, {transform_indices = @transform_4, window_bounds = array<i64: 128, 128>}]} {
    %c2_i32 = arith.constant 2 : i32
    %c0_i32 = arith.constant 0 : i32
    %0 = arith.cmpi eq, %c2_i32, %c0_i32 : i32
    %c1_i32 = arith.constant 1 : i32
    %1 = arith.select %0, %c1_i32, %c2_i32 : i32
    %2 = arith.remsi %arg0, %1 : i32
    %c0_i32_0 = arith.constant 0 : i32
    %3 = arith.cmpi ne, %2, %c0_i32_0 : i32
    %c0_i32_1 = arith.constant 0 : i32
    %4 = arith.cmpi slt, %2, %c0_i32_1 : i32
    %c0_i32_2 = arith.constant 0 : i32
    %5 = arith.cmpi slt, %1, %c0_i32_2 : i32
    %6 = arith.xori %4, %5 : i1
    %7 = arith.andi %6, %3 : i1
    %8 = arith.addi %2, %1 : i32
    %9 = arith.select %7, %8, %2 : i32
    %c1_i32_3 = arith.constant 1 : i32
    %10 = arith.subi %c1_i32_3, %9 : i32
    %c128_i32 = arith.constant 128 : i32
    %11 = arith.muli %arg1, %c128_i32 : i32
    %12 = tpu.assume_multiple %11, 128 : i32
    %c0_i32_4 = arith.constant 0 : i32
    %13 = arith.cmpi eq, %arg0, %c0_i32_4 : i32
    %c0_i32_5 = arith.constant 0 : i32
    %14 = arith.cmpi eq, %arg1, %c0_i32_5 : i32
    %15 = arith.andi %13, %14 : i1
    %16 = arith.extui %15 : i1 to i32
    %c0_i32_6 = arith.constant 0 : i32
    %17 = arith.cmpi ne, %16, %c0_i32_6 : i32
    scf.if %17 {
      %c0_i32_20 = arith.constant 0 : i32
      %c0_i32_21 = arith.constant 0 : i32
      %c0_i32_22 = arith.constant 0 : i32
      %c0_i32_23 = arith.constant 0 : i32
      %38 = tpu.memref_slice %arg7[%c0_i32_20, %c0_i32_22, %c0_i32_23] : memref<2x128x128xbf16, #tpu.memory_space<vmem>> -> memref<1x128x128xbf16, #tpu.memory_space<vmem>>
      %39 = tpu.memref_squeeze %38 : memref<1x128x128xbf16, #tpu.memory_space<vmem>> -> memref<128x128xbf16, #tpu.memory_space<vmem>>
      %40 = tpu.memref_slice %arg8[%c0_i32_21] : memref<2x!tpu.dma_semaphore, #tpu.memory_space<semaphore_mem>> -> memref<1x!tpu.dma_semaphore, #tpu.memory_space<semaphore_mem>>
      %41 = tpu.memref_squeeze %40 : memref<1x!tpu.dma_semaphore, #tpu.memory_space<semaphore_mem>> -> memref<!tpu.dma_semaphore, #tpu.memory_space<semaphore_mem>>
      tpu.enqueue_dma source(%arg3 : memref<128x128xbf16, #tpu.memory_space<any>>) target(%39 : memref<128x128xbf16, #tpu.memory_space<vmem>>) target_semaphore(%41 : memref<!tpu.dma_semaphore, #tpu.memory_space<semaphore_mem>>)
      %c1_i32_24 = arith.constant 1 : i32
      %42 = tpu.memref_slice %arg8[%c1_i32_24] : memref<2x!tpu.dma_semaphore, #tpu.memory_space<semaphore_mem>> -> memref<1x!tpu.dma_semaphore, #tpu.memory_space<semaphore_mem>>
      %43 = tpu.memref_squeeze %42 : memref<1x!tpu.dma_semaphore, #tpu.memory_space<semaphore_mem>> -> memref<!tpu.dma_semaphore, #tpu.memory_space<semaphore_mem>>
      tpu.enqueue_dma source(%arg2 : memref<128x128xbf16, #tpu.memory_space<any>>) target(%arg9 : memref<128x128xbf16, #tpu.memory_space<vmem>>) target_semaphore(%43 : memref<!tpu.dma_semaphore, #tpu.memory_space<semaphore_mem>>)
      %c0_i32_25 = arith.constant 0 : i32
      %c0_i32_26 = arith.constant 0 : i32
      %c0_i32_27 = arith.constant 0 : i32
      %c0_i32_28 = arith.constant 0 : i32
      %44 = tpu.memref_slice %arg7[%c0_i32_25, %c0_i32_27, %c0_i32_28] : memref<2x128x128xbf16, #tpu.memory_space<vmem>> -> memref<1x128x128xbf16, #tpu.memory_space<vmem>>
      %45 = tpu.memref_squeeze %44 : memref<1x128x128xbf16, #tpu.memory_space<vmem>> -> memref<128x128xbf16, #tpu.memory_space<vmem>>
      %46 = tpu.memref_slice %arg8[%c0_i32_26] : memref<2x!tpu.dma_semaphore, #tpu.memory_space<semaphore_mem>> -> memref<1x!tpu.dma_semaphore, #tpu.memory_space<semaphore_mem>>
      %47 = tpu.memref_squeeze %46 : memref<1x!tpu.dma_semaphore, #tpu.memory_space<semaphore_mem>> -> memref<!tpu.dma_semaphore, #tpu.memory_space<semaphore_mem>>
      tpu.wait_dma2 semaphore(%47 : memref<!tpu.dma_semaphore, #tpu.memory_space<semaphore_mem>>) src(%arg3 : memref<128x128xbf16, #tpu.memory_space<any>>) dst(%45 : memref<128x128xbf16, #tpu.memory_space<vmem>>)
      %c1_i32_29 = arith.constant 1 : i32
      %48 = tpu.memref_slice %arg8[%c1_i32_29] : memref<2x!tpu.dma_semaphore, #tpu.memory_space<semaphore_mem>> -> memref<1x!tpu.dma_semaphore, #tpu.memory_space<semaphore_mem>>
      %49 = tpu.memref_squeeze %48 : memref<1x!tpu.dma_semaphore, #tpu.memory_space<semaphore_mem>> -> memref<!tpu.dma_semaphore, #tpu.memory_space<semaphore_mem>>
      tpu.wait_dma2 semaphore(%49 : memref<!tpu.dma_semaphore, #tpu.memory_space<semaphore_mem>>) src(%arg2 : memref<128x128xbf16, #tpu.memory_space<any>>) dst(%arg9 : memref<128x128xbf16, #tpu.memory_space<vmem>>)
    } else {
    }
    %18 = arith.index_cast %12 : i32 to index
    %c0 = arith.constant 0 : index
    %19 = vector.load %arg9[%18, %c0] : memref<128x128xbf16, #tpu.memory_space<vmem>>, vector<128x128xbf16>
    %20 = arith.index_cast %9 : i32 to index
    %c0_7 = arith.constant 0 : index
    %c0_8 = arith.constant 0 : index
    %21 = vector.load %arg7[%20, %c0_7, %c0_8] : memref<2x128x128xbf16, #tpu.memory_space<vmem>>, vector<1x128x128xbf16>
    %22 = vector.shape_cast %21 : vector<1x128x128xbf16> to vector<128x128xbf16>
    %cst = arith.constant dense<0.000000e+00> : vector<128x128xf32>
    %23 = tpu.matmul %19, %22, %cst {dimension_numbers = #tpu.dot_dimension_numbers<[1], [0], [0], [1], [0, 0, 1, 1], [], []>} : vector<128x128xbf16>, vector<128x128xbf16>, vector<128x128xf32> -> vector<128x128xf32>
    %24 = arith.truncf %23 : vector<128x128xf32> to vector<128x128xbf16>
    %c0_9 = arith.constant 0 : index
    %c0_10 = arith.constant 0 : index
    %c0_11 = arith.constant 0 : index
    %25 = vector.load %arg4[%c0_9, %c0_10, %c0_11] : memref<1x128x128xbf16, #tpu.memory_space<vmem>>, vector<1x128x128xbf16>
    %26 = vector.shape_cast %25 : vector<1x128x128xbf16> to vector<128x128xbf16>
    %cst_12 = arith.constant dense<0.000000e+00> : vector<128x128xf32>
    %27 = tpu.matmul %24, %26, %cst_12 {dimension_numbers = #tpu.dot_dimension_numbers<[1], [0], [0], [1], [0, 0, 1, 1], [], []>} : vector<128x128xbf16>, vector<128x128xbf16>, vector<128x128xf32> -> vector<128x128xf32>
    %c0_13 = arith.constant 0 : index
    %c0_14 = arith.constant 0 : index
    %c0_15 = arith.constant 0 : index
    %28 = vector.load %arg5[%c0_13, %c0_14, %c0_15] : memref<1x1x128xf32, #tpu.memory_space<vmem>>, vector<1x1x128xf32>
    %29 = vector.shape_cast %28 : vector<1x1x128xf32> to vector<1x128xf32>
    %30 = vector.broadcast %29 : vector<1x128xf32> to vector<128x128xf32>
    %31 = arith.addf %27, %30 : vector<128x128xf32>
    %c2_i32_16 = arith.constant 2 : i32
    %32 = arith.cmpi slt, %arg0, %c2_i32_16 : i32
    %33 = arith.extui %32 : i1 to i32
    %c0_i32_17 = arith.constant 0 : i32
    %34 = arith.cmpi ne, %33, %c0_i32_17 : i32
    scf.if %34 {
      %cst_20 = arith.constant 0.000000e+00 : f32
      %38 = vector.broadcast %cst_20 : f32 to vector<128x128xf32>
      %39 = arith.maximumf %31, %38 : vector<128x128xf32>
      %40 = arith.truncf %39 : vector<128x128xf32> to vector<128x128xbf16>
      %41 = arith.index_cast %10 : i32 to index
      %42 = arith.index_cast %12 : i32 to index
      %c0_21 = arith.constant 0 : index
      %43 = vector.load %arg7[%41, %42, %c0_21] : memref<2x128x128xbf16, #tpu.memory_space<vmem>>, vector<1x128x128xbf16>
      %44 = vector.shape_cast %43 : vector<1x128x128xbf16> to vector<128x128xbf16>
      %45 = vector.shape_cast %40 : vector<128x128xbf16> to vector<1x128x128xbf16>
      tpu.vector_store %arg7[%41, %42, %c0_21], %45 {strides = array<i32>} : memref<2x128x128xbf16, #tpu.memory_space<vmem>>, vector<1x128x128xbf16>,
    } else {
    }
    %c2_i32_18 = arith.constant 2 : i32
    %35 = arith.cmpi eq, %arg0, %c2_i32_18 : i32
    %36 = arith.extui %35 : i1 to i32
    %c0_i32_19 = arith.constant 0 : i32
    %37 = arith.cmpi ne, %36, %c0_i32_19 : i32
    scf.if %37 {
      %38 = tpu.iota {dimensions = array<i32: 1>} : vector<128x128xi32>
      %c2_i32_20 = arith.constant 2 : i32
      %39 = vector.broadcast %c2_i32_20 : i32 to vector<128x128xi32>
      %40 = arith.cmpi slt, %38, %39 : vector<128x128xi32>
      %cst_21 = arith.constant -1.000000e+30 : f32
      %41 = vector.broadcast %cst_21 : f32 to vector<128x128xf32>
      %42 = arith.select %40, %31, %41 : vector<128x128xi1>, vector<128x128xf32>
      %cst_22 = arith.constant dense<0xFF800000> : vector<128xf32>
      %43 = vector.multi_reduction <maximumf>, %42, %cst_22 [1] : vector<128x128xf32> to vector<128xf32>
      %44 = vector.shape_cast %43 : vector<128xf32> to vector<128x1xf32>
      %45 = vector.broadcast %44 : vector<128x1xf32> to vector<128x128xf32>
      %46 = arith.subf %42, %45 : vector<128x128xf32>
      %47 = math.exp %46 : vector<128x128xf32>
      %cst_23 = arith.constant dense<0.000000e+00> : vector<128xf32>
      %48 = vector.multi_reduction <add>, %47, %cst_23 [1] : vector<128x128xf32> to vector<128xf32>
      %49 = vector.shape_cast %48 : vector<128xf32> to vector<128x1xf32>
      %50 = math.log %49 : vector<128x1xf32>
      %51 = arith.addf %44, %50 : vector<128x1xf32>
      %52 = vector.broadcast %51 : vector<128x1xf32> to vector<128x128xf32>
      %53 = arith.subf %42, %52 : vector<128x128xf32>
      %c0_24 = arith.constant 0 : index
      %c0_25 = arith.constant 0 : index
      %54 = vector.load %arg6[%c0_24, %c0_25] : memref<128x128xf32, #tpu.memory_space<vmem>>, vector<128x128xf32>
      tpu.vector_store %arg6[%c0_24, %c0_25], %53 {strides = array<i32>} : memref<128x128xf32, #tpu.memory_space<vmem>>, vector<128x128xf32>,
    } else {
    }
    return
  }
  func.func @transform_2(%arg0: i32, %arg1: i32) -> (i32, i32, i32) {
    %c0_i32 = arith.constant 0 : i32
    %c0_i32_0 = arith.constant 0 : i32
    %c0_i32_1 = arith.constant 0 : i32
    return %arg0, %c0_i32, %c0_i32_0 : i32, i32, i32
  }
  func.func @transform_3(%arg0: i32, %arg1: i32) -> (i32, i32, i32) {
    %c0_i32 = arith.constant 0 : i32
    %c0_i32_0 = arith.constant 0 : i32
    %c0_i32_1 = arith.constant 0 : i32
    return %arg0, %c0_i32, %c0_i32_0 : i32, i32, i32
  }
  func.func @transform_4(%arg0: i32, %arg1: i32) -> (i32, i32) {
    %c2_i32 = arith.constant 2 : i32
    %0 = arith.cmpi eq, %arg0, %c2_i32 : i32
    %c0_i32 = arith.constant 0 : i32
    %1 = arith.select %0, %arg1, %c0_i32 : i32
    %c0_i32_0 = arith.constant 0 : i32
    %c0_i32_1 = arith.constant 0 : i32
    return %1, %c0_i32_0 : i32, i32
  }
}

</mosaic_0001>

<bundles_post_ra>
// kernel: tpu_custom_call.1
= control target key start
LH: loop header
LB: loop body
LE: loop exit
PB: predicated region body
PF: predicated region fallthrough
CT: control target
= control target key end

     0   :  { %9 = vsyncpa [#allocation6], 0  ;;  %s1878_s0 = inlined_call_operand.hbm [shape: bf16[128,128], index: 0, kind: input, shape index: {}]   ;;  %s1879_s1 = inlined_call_operand.hbm [shape: bf16[128,128], index: 1, kind: input, shape index: {}]   ;;  %s1880_s2 = inlined_call_operand.hbm [shape: bf16[3,128,128], index: 2, kind: input, shape index: {}]   ;;  %s1881_s3 = inlined_call_operand.vmem [shape: f32[3,1,128], index: 3, kind: input, shape index: {}]   ;;  %s1882_s4 = inlined_call_operand.hbm [shape: f32[128,128], index: 4, kind: output, shape index: {}]  }
   0x1   :  { %11 = vsyncpa [#allocation6 + $0x1], 0 }
   0x2   :  { %12 = vsyncpa [#allocation7], 0 }
   0x3   :  { %14 = vsyncpa [#allocation7 + $0x1], 0  ;;  %s1413_s15 = smov 0   ;;  %s1415_s16 = smov 0  }
   0x4   :  { %s1417_s17 = smov 0   ;;  %s1419_s18 = smov 0  }
   0x5   :  { %s1421_s19 = smov 0   ;;  %s1423_s20 = smov 0  }
   0x6 LB: > { %s925_s21 = sadd.s32 4294967295, %s1378_s20   ;;  %s926_s22 = sadd.s32 4294967294, %s1378_s20   ;;  %s1378_s20 = sphi %s1423_s20, %s20_s20   ;;  %s1374_s19 = sphi %s1421_s19, %s1892_s19   ;;  %s1370_s18 = sphi %s1419_s18, %s1891_s18   ;;  %s1366_s17 = sphi %s1417_s17, %s1890_s17   ;;  %s1362_s16 = sphi %s1415_s16, %s1889_s16   ;;  %s1358_s15 = sphi %s1413_s15, %s1888_s15  }
   0x7   : > { %s32_s23 = sadd.s32 1, %s1374_s19  ;;  %s39_s24 = sadd.s32 1, %s1366_s17 }
   0x8   : > { %p34_p0 = scmp.ge.s32.totalorder %s32_s23, 3  ;;  %p46_p1 = scmp.ne.s32.totalorder %s1366_s17, %s1362_s16 }
   0x9   : > { %p47_p2 = scmp.eq.s32.totalorder %s1378_s20, 0  ;;  %p52_p3 = scmp.ne.s32.totalorder %s1362_s16, %s1358_s15 }
   0xa   : > { %s1894_s23 = smov (%p34_p0, %s32_s23), 0  ;;  %p53_p5 = scmp.eq.s32.totalorder %s925_s21, 0 }
   0xb   : > { %p1451_p4 = por %p47_p2, %p46_p1  ;;  %s36_s26 = ssub.s32 %s1374_s19, %s1894_s23 }
   0xc   : > { %p37_p6 = scmp.eq.s32.totalorder %s36_s26, 0  ;;  %p1459_p7 = por %p53_p5, %p52_p3 }
   0xd   : > { %p1077_p8 = scmp.lt.s32.totalorder %s1378_s20, 3  ;;  %s132_s28 = sand.u32 1, %s1366_s17  }
   0xe   : > { %s1466_s29 = scalar_select %p37_p6, %s1366_s17, %s39_s24  }
   0xf   : > { %s929_s30 = sshll.u32 %s132_s28, 6  ;;  %s959_s5 = sshll.u32 %s1374_s19, 10 }
  0x10   : > { %s1472_s8 = scalar_lea.hbm %s1880_s2, %s959_s5  ;;  %s136_s9 = scalar_lea.vmem [#allocation5], %s929_s30 }
  0x11   : > { %s143_s10 = sshll.u32 %s136_s9, 4  ;;  %p1478_p9 = pnand %p1077_p8, %p1451_p4  ;;  %s1474_s10 = int_to_ptr.vmem [resolvable:$true] %s143_s10 }
  0x12   : > { %s1483_s12 = scalar_lea.sflag [#allocation6], %s132_s28  ;;  %s1208_s13 = scalar_lea.hbm %s1472_s8, 1024 }
  0x13   : > { %p1209_p11 = scmp.ne.s32.totalorder %s1472_s8, %s1208_s13  ;;  %p1210_p12 = pneg %p1478_p9 }
  0x14   : > { %s1213_s24 = scalar_lea.hbm %s1880_s2, 3072  ;;  %p1214_p1 = scmp.lt.u32.totalorder %s1472_s8, %s1880_s2 }
  0x15   : > { %p1211_p13 = pnand %p1210_p12, %p1209_p11  ;;  %p1215_p2 = scmp.lt.u32.totalorder %s1213_s24, %s1208_s13 }
  0x16   : > { %p1217_p4 = scmp.lt.u32.totalorder %s1208_s13, %s1472_s8 }
  0x17   : > { %p1212_p0 = pneg %p1211_p13  ;;  %p1216_p3 = por %p1215_p2, %p1214_p1 }
  0x19   : > { %p1218_p5 = por %p1217_p4, %p1216_p3 }
  0x1b   : > { %p1219_p6 = pnand %p1218_p5, %p1212_p0 }
  0x1d   : > { %1222 = shalt.err (!%p1219_p6)
}
  0x1e   : > { %s1223_s28 = scalar_lea.vmem %s1474_s10, 1024  ;;  %s1380_s30 = smov [#allocation5]  }
  0x1f   : > { %p1224_p8 = scmp.ne.s32.totalorder %s1474_s10, %s1223_s28  ;;  %s1228_s5 = sshll.u32 %s1380_s30, 4  ;;  %s1229_s5 = int_to_ptr.vmem [resolvable:$false] %s1228_s5 }
  0x20   : > { %s1230_s6 = scalar_lea.vmem %s1229_s5, 2048  ;;  %p1231_p10 = scmp.lt.s32.totalorder %s1474_s10, %s1229_s5 }
  0x21   : > { %p1226_p11 = pnand %p1224_p8, %p1210_p12  ;;  %p1232_p1 = scmp.lt.s32.totalorder %s1230_s6, %s1223_s28 }
  0x23   : > { %p1227_p13 = pneg %p1226_p11  ;;  %p1233_p2 = por %p1232_p1, %p1231_p10 }
  0x25   : > { %p1234_p3 = pnand %p1233_p2, %p1227_p13 }
  0x27   : > { %1237 = shalt.err (!%p1234_p3)
}
  0x28   : > { %s1381_s7 = smov 64   ;;  %s1382_s9 = smov 4  }
  0x29   : > { %1072 = dma.hbm_to_vmem [thread:$0]  (!%p1478_p9), %s1472_s8, 1024, %s1474_s10, %s1483_s12, %s1381_s7, %s1381_s7, %s1382_s9  }
  0x2a   : > { %p157_p12 = scmp.lt.s32.totalorder %s1378_s20, 4  ;;  %p1886_p0 = scmp.ge.s32.totalorder %s1378_s20, 1 }
  0x2c   : > { %p158_p4 = pnand %p1886_p0, %p157_p12 }
  0x2d   : > { %s163_s13 = sand.u32 (!%p158_p4), 1, %s1362_s16  }
  0x2e   : > { %161 = sbr.rel (%p158_p4) target bundleno = 987 (0x3db), region = 28  ;;  %s933_s14 = sshll.u32 (!%p158_p4), %s163_s13, 6 }
  0x2f   : > { %s164_s15 = scalar_lea.sflag (!%p158_p4), [#allocation6], %s163_s13  ;;  %s1515_s24 = scalar_lea.vmem (!%p158_p4), [#allocation5], %s933_s14 }
  0x35   : > { %1341 = dma.done.wait (%p1459_p7), %s164_s15, 1024  }
  0x36   : > { %1343 = vsyncadd (%p1459_p7), %s164_s15, 4294966272  ;;  %p191_p9 = scmp.lt.s32.totalorder %s1370_s18, 2  ;;  %p198_p10 = scmp.lt.s32.totalorder %s1370_s18, 0 }
  0x37   : > { %s199_s8 = ssub.s32 0, %s1370_s18  ;;  %p212_p5 = scmp.eq.s32.totalorder %s1370_s18, 0 }
  0x38   : > { %s1526_s10 = scalar_select %p191_p9, %s1370_s18, 2 }
  0x39   : > { %s934_s11 = smin.u32 %s1370_s18, %s199_s8  ;;  %s1383_s30 = smov [#allocation2]  }
  0x3a   : > { %s193_s27 = scalar_lea.vmem %s1881_s3, %s1526_s10  ;;  %s201_s26 = sand.u32 1, %s934_s11  }
  0x3b   : > { %s202_s28 = ssub.s32 0, %s201_s26  ;;  %s225_s5 = sshll.u32 %s1383_s30, 4  ;;  %s226_s5 = int_to_ptr.vmem [resolvable:$true] %s225_s5 }
  0x3c   : > { %s1896_s28 = smov (!%p198_p10, %s202_s28), %s201_s26  ;;  %s1238_s13 = scalar_lea.hbm %s1879_s1, 1024 }
  0x3d   : > { %p936_p7 = scmp.lt.s32.totalorder %s1896_s28, 0  ;;  %s208_s6 = sadd.s32 2, %s1896_s28 }
  0x3e   : > { %p1239_p6 = scmp.ne.s32.totalorder %s1879_s1, %s1238_s13  ;;  %p1244_p13 = scmp.lt.u32.totalorder %s1238_s13, %s1879_s1 }
  0x40   : > { %p1240_p8 = pnand %p1239_p6, %p212_p5 }
  0x42   : > { %p1241_p11 = pneg %p1240_p8 }
  0x44   : > { %p1246_p1 = pnand %p1244_p13, %p1241_p11 }
  0x46   : > { %1249 = shalt.err (!%p1246_p1)  }
  0x47   : > { %s1250_s12 = scalar_lea.vmem %s226_s5, 1024  ;;  %s1256_s25 = scalar_lea.vmem %s226_s5, 2048 }
  0x48   : > { %p1251_p2 = scmp.ne.s32.totalorder %s226_s5, %s1250_s12  ;;  %p1257_p0 = scmp.lt.s32.totalorder %s226_s5, %s226_s5 }
  0x49   : > { %p1258_p4 = scmp.lt.s32.totalorder %s1256_s25, %s1250_s12 }
  0x4a   : > { %p1252_p3 = pnand %p1251_p2, %p212_p5 }
  0x4b   : > { %p1259_p9 = por %p1258_p4, %p1257_p0 }
  0x4c   : > { %p1253_p12 = pneg %p1252_p3 }
  0x4e   : > { %p1260_p10 = pnand %p1259_p9, %p1253_p12 }
  0x50   : > { %1263 = shalt.err (!%p1260_p10)  }
  0x51   : > { %1061 = dma.hbm_to_vmem [thread:$0]  (%p212_p5), %s1879_s1, 1024, %s226_s5, [#allocation3] }
  0x52   : > { %s1898_s6 = smov (!%p936_p7, %s208_s6), %s1896_s28  ;;  %s1384_s7 = smov [#allocation4]  }
  0x53   : > { %s237_s9 = sshll.u32 %s1384_s7, 4  ;;  %s210_s13 = ssub.s32 1, %s1898_s6  ;;  %s238_s9 = int_to_ptr.vmem [resolvable:$true] %s237_s9 }
  0x54   : > { %s1264_s8 = scalar_lea.hbm %s1878_s0, 1024 }
  0x55   : > { %p1265_p6 = scmp.ne.s32.totalorder %s1878_s0, %s1264_s8  ;;  %p1270_p7 = scmp.lt.u32.totalorder %s1264_s8, %s1878_s0 }
  0x57   : > { %p1266_p8 = pnand %p1265_p6, %p212_p5 }
  0x59   : > { %p1267_p11 = pneg %p1266_p8 }
  0x5b   : > { %p1272_p13 = pnand %p1270_p7, %p1267_p11 }
  0x5d   : > { %1275 = shalt.err (!%p1272_p13)  }
  0x5e   : > { %s1276_s28 = scalar_lea.vmem %s238_s9, 1024  ;;  %p1283_p12 = scmp.lt.s32.totalorder %s238_s9, %s238_s9 }
  0x5f   : > { %p1277_p1 = scmp.ne.s32.totalorder %s238_s9, %s1276_s28  ;;  %p1284_p0 = scmp.lt.s32.totalorder %s1276_s28, %s1276_s28 }
  0x61   : > { %p1278_p2 = pnand %p1277_p1, %p212_p5  ;;  %p1285_p4 = por %p1284_p0, %p1283_p12 }
  0x63   : > { %p1279_p3 = pneg %p1278_p2 }
  0x65   : > { %p1286_p9 = pnand %p1285_p4, %p1279_p3 }
  0x67   : > { %1289 = shalt.err (!%p1286_p9)  }
  0x68   : > { %1062 = dma.hbm_to_vmem [thread:$0]  (%p212_p5), %s1878_s0, 1024, %s238_s9, [#allocation3 + $0x1] }
  0x69   : > { %1345 = dma.done.wait (%p212_p5), [#allocation3], 1024 }
  0x6a   : > { %1347 = vsyncadd (%p212_p5), [#allocation3], 4294966272 }
  0x6b   : > { %1349 = dma.done.wait (%p212_p5), [#allocation3 + $0x1], 1024 }
  0x6c   : > { %1351 = vsyncadd (%p212_p5), [#allocation3 + $0x1], 4294966272  ;;  %s961_s7 = sshll.u32 %s1898_s6, 6  ;;  %v251_v2 = vld [vmem:[#allocation4] sm:$0xff]  ;;  %v1137_v5 = vld [vmem:[%s1515_s24 + $0x8] sm:$0xff]   ;;  %p949_p5 = scmp.ge.s32.totalorder %s1370_s18, 2 }
  0x6d   : > { %s1582_s14 = scalar_lea.vmem [#allocation2], %s961_s7  ;;  %1011 = vmatprep.mubr.bf16.mxu0 %v251_v2  ;;  %v1136_v4 = vld [vmem:[%s1515_s24] sm:$0xff]   ;;  %v1138_v7 = vld [vmem:[%s1515_s24 + $0x10] sm:$0xff]   ;;  %v1139_v9 = vld [vmem:[%s1515_s24 + $0x18] sm:$0xff]   ;;  %s962_s10 = sshll.u32 (!%p949_p5), %s210_s13, 6 }
  0x6e   : > { %v262_v0 = vld [vmem:[%s1582_s14] sm:$0xff]  ;;  %v263_v1 = vld [vmem:[%s1582_s14 + $0x8] sm:$0xff]  ;;  %v264_v3 = vld [vmem:[%s1582_s14 + $0x10] sm:$0xff]  ;;  %1027 = vmatprep.subr.bf16.mxu1 %v1136_v4 }
  0x6f   : > { %995 = vmatprep.subr.bf16.mxu0 %v262_v0  ;;  %v265_v6 = vld [vmem:[%s1582_s14 + $0x18] sm:$0xff]  ;;  %1028 = vmatpush3.bf16.msra.mxu1 %v1136_v4  ;;  %v266_v8 = vld [vmem:[%s1582_s14 + $0x20] sm:$0xff]  ;;  %v267_v10 = vld [vmem:[%s1582_s14 + $0x28] sm:$0xff] }
  0x70   : > { %996 = vmatpush3.bf16.msra.mxu0 %v262_v0  ;;  %1029 = vmatprep.subr.bf16.mxu1 %v1137_v5  ;;  %v1140_v11 = vld [vmem:[%s1515_s24 + $0x20] sm:$0xff]   ;;  %v268_v12 = vld [vmem:[%s1582_s14 + $0x30] sm:$0xff]  ;;  %v1141_v13 = vld [vmem:[%s1515_s24 + $0x28] sm:$0xff]  }
  0x71   : > { %997 = vmatprep.subr.bf16.mxu0 %v263_v1  ;;  %v269_v14 = vld [vmem:[%s1582_s14 + $0x38] sm:$0xff]  ;;  %v1142_v15 = vld [vmem:[%s1515_s24 + $0x30] sm:$0xff]   ;;  %v252_v16 = vld [vmem:[#allocation4 + $0x8] sm:$0xff] }
  0x72   : > { %v253_v17 = vld [vmem:[#allocation4 + $0x10] sm:$0xff]  ;;  %v254_v18 = vld [vmem:[#allocation4 + $0x18] sm:$0xff]  ;;  %v255_v19 = vld [vmem:[#allocation4 + $0x20] sm:$0xff] }
  0x73   : > { %1030 = vmatpush3.bf16.msra.mxu1 %v1137_v5  ;;  %v256_v20 = vld [vmem:[#allocation4 + $0x28] sm:$0xff]  ;;  %v257_v21 = vld [vmem:[#allocation4 + $0x30] sm:$0xff]  ;;  %v258_v22 = vld [vmem:[#allocation4 + $0x38] sm:$0xff] }
  0x74   : > { %998 = vmatpush3.bf16.msra.mxu0 %v263_v1  ;;  %1031 = vmatprep.subr.bf16.mxu1 %v1138_v7  ;;  %v1143_v23 = vld [vmem:[%s1515_s24 + $0x38] sm:$0xff]   ;;  %v940_v48 = vld [vmem:[%s193_s27] ss:$0 sm:$0xff]  ;;  %s574_s27 = scalar_lea.vmem (!%p949_p5), [#allocation2], %s962_s10 }
  0x75   : > { %999 = vmatprep.subr.bf16.mxu0 %v264_v3 }
  0x77   : > { %1032 = vmatpush3.bf16.msra.mxu1 %v1138_v7 }
  0x78   : > { %1000 = vmatpush3.bf16.msra.mxu0 %v264_v3  ;;  %1033 = vmatprep.subr.bf16.mxu1 %v1139_v9 }
  0x79   : > { %1001 = vmatprep.subr.bf16.mxu0 %v265_v6 }
  0x7b   : > { %1034 = vmatpush3.bf16.msra.mxu1 %v1139_v9 }
  0x7c   : > { %1002 = vmatpush3.bf16.msra.mxu0 %v265_v6  ;;  %1035 = vmatprep.subr.bf16.mxu1 %v1140_v11 }
  0x7d   : > { %1003 = vmatprep.subr.bf16.mxu0 %v266_v8 }
  0x7f   : > { %1036 = vmatpush3.bf16.msra.mxu1 %v1140_v11 }
  0x80   : > { %1004 = vmatpush3.bf16.msra.mxu0 %v266_v8  ;;  %1037 = vmatprep.subr.bf16.mxu1 %v1141_v13 }
  0x81   : > { %1005 = vmatprep.subr.bf16.mxu0 %v267_v10 }
  0x83   : > { %1038 = vmatpush3.bf16.msra.mxu1 %v1141_v13 }
  0x84   : > { %1006 = vmatpush3.bf16.msra.mxu0 %v267_v10  ;;  %1039 = vmatprep.subr.bf16.mxu1 %v1142_v15 }
  0x85   : > { %1007 = vmatprep.subr.bf16.mxu0 %v268_v12 }
  0x87   : > { %1040 = vmatpush3.bf16.msra.mxu1 %v1142_v15 }
  0x88   : > { %1008 = vmatpush3.bf16.msra.mxu0 %v268_v12  ;;  %1041 = vmatprep.subr.bf16.mxu1 %v1143_v23 }
  0x89   : > { %1009 = vmatprep.subr.bf16.mxu0 %v269_v14 }
  0x8b   : > { %1042 = vmatpush3.bf16.msra.mxu1 %v1143_v23 }
  0x8c   : > { %1010 = vmatpush3.bf16.msra.mxu0 %v269_v14 }
  0x8f   : > { %1012 = vmatmul.mubr.bf16.vlgmr.msra.gmra.mrb[0].mxu0 %v252_v16 }
  0x90   : > { %1015 = vmatprep.mubr.bf16.mxu0 %v253_v17 }
  0x97   : > { %1016 = vmatmul.mubr.bf16.gmra.mrb[4].mxu0 %v254_v18 }
  0x98   : > { %1019 = vmatprep.mubr.bf16.mxu0 %v255_v19 }
  0x9f   : > { %1020 = vmatmul.mubr.bf16.gmra.mrb[8].mxu0 %v256_v20 }
  0xa0   : > { %1023 = vmatprep.mubr.bf16.mxu0 %v257_v21 }
  0xa7   : > { %1024 = vmatmul.mubr.bf16.gmra.mrb[12].mxu0 %v258_v22 }
 0x162   : > { %v1013_v24 = vpop.f32.mrb[0].mxu0 }
 0x163   : > { %v304_v25 = vpop.f32.mrb[1].mxu0 }
 0x164   : > { %v1014_v26 = vpop.f32.mrb[2].mxu0 }
 0x165   : > { %v368_v27 = vpack.c.bf16 %v1014_v26, %v1013_v24  ;;  %v307_v28 = vpop.f32.mrb[3].mxu0 }
 0x166   : > { %v367_v29 = vpack.c.bf16 %v307_v28, %v304_v25 }
 0x168   : > { %1043 = vmatprep.mubr.bf16.mxu1 %v367_v29 }
 0x169   : > { %1044 = vmatmul.mubr.bf16.vlgmr.msra.gmra.mrb[0].mxu1 %v368_v27 }
 0x16a   : > { %v1017_v30 = vpop.f32.mrb[4].mxu0 }
 0x16b   : > { %v320_v31 = vpop.f32.mrb[5].mxu0 }
 0x16c   : > { %v1018_v32 = vpop.f32.mrb[6].mxu0 }
 0x16d   : > { %v370_v33 = vpack.c.bf16 %v1018_v32, %v1017_v30  ;;  %v323_v34 = vpop.f32.mrb[7].mxu0 }
 0x16e   : > { %v369_v35 = vpack.c.bf16 %v323_v34, %v320_v31 }
 0x170   : > { %1047 = vmatprep.mubr.bf16.mxu1 %v369_v35 }
 0x171   : > { %1048 = vmatmul.mubr.bf16.gmra.mrb[4].mxu1 %v370_v33 }
 0x172   : > { %v1021_v36 = vpop.f32.mrb[8].mxu0 }
 0x173   : > { %v336_v37 = vpop.f32.mrb[9].mxu0 }
 0x174   : > { %v1022_v38 = vpop.f32.mrb[10].mxu0 }
 0x175   : > { %v372_v39 = vpack.c.bf16 %v1022_v38, %v1021_v36  ;;  %v339_v40 = vpop.f32.mrb[11].mxu0 }
 0x176   : > { %v371_v41 = vpack.c.bf16 %v339_v40, %v336_v37 }
 0x178   : > { %1051 = vmatprep.mubr.bf16.mxu1 %v371_v41 }
 0x179   : > { %1052 = vmatmul.mubr.bf16.gmra.mrb[8].mxu1 %v372_v39 }
 0x17a   : > { %v1025_v42 = vpop.f32.mrb[12].mxu0 }
 0x17b   : > { %v352_v43 = vpop.f32.mrb[13].mxu0 }
 0x17c   : > { %v1026_v44 = vpop.f32.mrb[14].mxu0 }
 0x17d   : > { %v374_v45 = vpack.c.bf16 %v1026_v44, %v1025_v42  ;;  %v355_v46 = vpop.f32.mrb[15].mxu0 }
 0x17e   : > { %v373_v47 = vpack.c.bf16 %v355_v46, %v352_v43 }
 0x180   : > { %1055 = vmatprep.mubr.bf16.mxu1 %v373_v47 }
 0x181   : > { %1056 = vmatmul.mubr.bf16.gmra.mrb[12].mxu1 %v374_v45 }
 0x23c   : > { %v1045_v49 = vpop.f32.mrb[0].mxu1 }
 0x23d   : > { %v1605_v50 = vadd.f32 %v1045_v49, %v940_v48  ;;  %v480_v51 = vpop.f32.mrb[1].mxu1 }
 0x23e   : > { %v1607_v52 = vadd.f32 %v940_v48, %v480_v51  ;;  %v1046_v53 = vpop.f32.mrb[2].mxu1 }
 0x23f   : > { %v1609_v54 = vadd.f32 %v1046_v53, %v940_v48  ;;  %v483_v55 = vpop.f32.mrb[3].mxu1  ;;  %v549_v19 = vmax.f32 (!%p949_p5), %v1605_v50, 0.0 }
 0x240   : > { %v1611_v56 = vadd.f32 %v940_v48, %v483_v55  ;;  %v547_v17 = vmax.f32 (!%p949_p5), %v1607_v52, 0.0 }
 0x241   : > { %v550_v20 = vmax.f32 (!%p949_p5), %v1609_v54, 0.0 }
 0x242   : > { %v548_v18 = vmax.f32 (!%p949_p5), %v1611_v56, 0.0 }
 0x243   : > { %v564_v26 = vpack.c.bf16 (!%p949_p5), %v550_v20, %v549_v19 }
 0x244   : > { %v1049_v57 = vpop.f32.mrb[4].mxu1  ;;  %v563_v25 = vpack.c.bf16 (!%p949_p5), %v548_v18, %v547_v17 }
 0x245   : > { %v1613_v58 = vadd.f32 %v1049_v57, %v940_v48  ;;  %v496_v59 = vpop.f32.mrb[5].mxu1  ;;  %576 = vst [vmem:[%s574_s27 + $0x8] sm:$0xff] (!%p949_p5), %v564_v26 }
 0x246   : > { %v1615_v60 = vadd.f32 %v940_v48, %v496_v59  ;;  %v1050_v61 = vpop.f32.mrb[6].mxu1  ;;  %575 = vst [vmem:[%s574_s27] sm:$0xff] (!%p949_p5), %v563_v25 }
 0x247   : > { %v1617_v62 = vadd.f32 %v1050_v61, %v940_v48  ;;  %v499_v63 = vpop.f32.mrb[7].mxu1  ;;  %v553_v23 = vmax.f32 (!%p949_p5), %v1613_v58, 0.0 }
 0x248   : > { %v1619_v0 = vadd.f32 %v940_v48, %v499_v63  ;;  %v551_v21 = vmax.f32 (!%p949_p5), %v1615_v60, 0.0 }
 0x249   : > { %v554_v24 = vmax.f32 (!%p949_p5), %v1617_v62, 0.0 }
 0x24a   : > { %v552_v22 = vmax.f32 (!%p949_p5), %v1619_v0, 0.0 }
 0x24b   : > { %v566_v30 = vpack.c.bf16 (!%p949_p5), %v554_v24, %v553_v23 }
 0x24c   : > { %v1053_v1 = vpop.f32.mrb[8].mxu1  ;;  %v565_v29 = vpack.c.bf16 (!%p949_p5), %v552_v22, %v551_v21 }
 0x24d   : > { %v1621_v2 = vadd.f32 %v1053_v1, %v940_v48  ;;  %v512_v3 = vpop.f32.mrb[9].mxu1  ;;  %578 = vst [vmem:[%s574_s27 + $0x18] sm:$0xff] (!%p949_p5), %v566_v30 }
 0x24e   : > { %v1623_v4 = vadd.f32 %v940_v48, %v512_v3  ;;  %v1054_v5 = vpop.f32.mrb[10].mxu1  ;;  %577 = vst [vmem:[%s574_s27 + $0x10] sm:$0xff] (!%p949_p5), %v565_v29 }
 0x24f   : > { %v1625_v6 = vadd.f32 %v1054_v5, %v940_v48  ;;  %v515_v7 = vpop.f32.mrb[11].mxu1  ;;  %v557_v31 = vmax.f32 (!%p949_p5), %v1621_v2, 0.0 }
 0x250   : > { %v1627_v8 = vadd.f32 %v940_v48, %v515_v7  ;;  %v555_v27 = vmax.f32 (!%p949_p5), %v1623_v4, 0.0 }
 0x251   : > { %v558_v32 = vmax.f32 (!%p949_p5), %v1625_v6, 0.0 }
 0x252   : > { %546 = sbr.rel (%p949_p5) target bundleno = 607 (0x25f), region = 48  ;;  %v556_v28 = vmax.f32 (!%p949_p5), %v1627_v8, 0.0 }
 0x253   : > { %v568_v37 = vpack.c.bf16 (!%p949_p5), %v558_v32, %v557_v31 }
 0x254   : > { %v1057_v9 = vpop.f32.mrb[12].mxu1  ;;  %v567_v33 = vpack.c.bf16 (!%p949_p5), %v556_v28, %v555_v27 }
 0x255   : > { %v1629_v10 = vadd.f32 %v1057_v9, %v940_v48  ;;  %v528_v11 = vpop.f32.mrb[13].mxu1  ;;  %580 = vst [vmem:[%s574_s27 + $0x28] sm:$0xff] (!%p949_p5), %v568_v37 }
 0x256   : > { %v1631_v12 = vadd.f32 %v940_v48, %v528_v11  ;;  %v1058_v13 = vpop.f32.mrb[14].mxu1  ;;  %579 = vst [vmem:[%s574_s27 + $0x20] sm:$0xff] (!%p949_p5), %v567_v33 }
 0x257   : > { %v1633_v14 = vadd.f32 %v1058_v13, %v940_v48  ;;  %v531_v15 = vpop.f32.mrb[15].mxu1  ;;  %v561_v36 = vmax.f32 (!%p949_p5), %v1629_v10, 0.0 }
 0x258   : > { %v1635_v16 = vadd.f32 %v940_v48, %v531_v15  ;;  %v559_v34 = vmax.f32 (!%p949_p5), %v1631_v12, 0.0 }
 0x259   : > { %v562_v38 = vmax.f32 %v1633_v14, 0.0 }
 0x25a   : > { %v560_v35 = vmax.f32 %v1635_v16, 0.0 }
 0x25b   : > { %v570_v40 = vpack.c.bf16 %v562_v38, %v561_v36 }
 0x25c   : > { %v569_v39 = vpack.c.bf16 %v560_v35, %v559_v34 }
 0x25d   : > { %582 = vst [vmem:[%s574_s27 + $0x38] sm:$0xff] %v570_v40 }
 0x25e   : > { %581 = vst [vmem:[%s574_s27 + $0x30] sm:$0xff] %v569_v39 }
 0x25f PF: > { %p952_p10 = scmp.ne.s32.totalorder %s1370_s18, 2 }
 0x260   : > { %v587_v41 = vlaneseq (!%p952_p10) }
 0x261   : > { %586 = sbr.rel (%p952_p10) target bundleno = 963 (0x3c3), region = 52 }
 0x262   : > { %v588_v42 = vand.u32 (!%p952_p10), 127, %v587_v41 }
 0x264   : > { %vm589_vm0 = vcmp.lt.s32.totalorder (!%p952_p10), %v588_v42, 2 }
 0x265   : > { %v1659_v43 = vsel (!%p952_p10), %vm589_vm0, %v1607_v52, -1e+30  ;;  %v1663_v44 = vsel (!%p952_p10), %vm589_vm0, %v1605_v50, -1e+30  ;;  %v1669_v45 = vsel (!%p952_p10), %vm589_vm0, %v1611_v56, -1e+30 }
 0x266   : > { %606 = vmax.xlane.f32.xlu0 (!%p952_p10), %v1659_v43  ;;  %610 = vmax.xlane.f32.xlu1 (!%p952_p10), %v1663_v44  ;;  %v1673_v46 = vsel (!%p952_p10), %vm589_vm0, %v1609_v54, -1e+30  ;;  %v1679_v47 = vsel (!%p952_p10), %vm589_vm0, %v1615_v60, -1e+30  ;;  %v1683_v48 = vsel (!%p952_p10), %vm589_vm0, %v1619_v0, -1e+30 }
 0x267   : > { %v1689_v49 = vsel (!%p952_p10), %vm589_vm0, %v1613_v58, -1e+30  ;;  %v1693_v50 = vsel (!%p952_p10), %vm589_vm0, %v1617_v62, -1e+30  ;;  %v1699_v51 = vsel (!%p952_p10), %vm589_vm0, %v1623_v4, -1e+30 }
 0x268   : > { %v1703_v52 = vsel %vm589_vm0, %v1627_v8, -1e+30  ;;  %v1709_v53 = vsel %vm589_vm0, %v1621_v2, -1e+30  ;;  %v1713_v54 = vsel %vm589_vm0, %v1625_v6, -1e+30 }
 0x269   : > { %v1719_v55 = vsel %vm589_vm0, %v1631_v12, -1e+30  ;;  %v1723_v56 = vsel %vm589_vm0, %v1635_v16, -1e+30  ;;  %v1729_v57 = vsel %vm589_vm0, %v1629_v10, -1e+30 }
 0x26a   : > { %608 = vmax.xlane.f32.xlu0 %v1669_v45  ;;  %612 = vmax.xlane.f32.xlu1 %v1673_v46  ;;  %v1733_v58 = vsel %vm589_vm0, %v1633_v14, -1e+30 }
 0x26e   : > { %614 = vmax.xlane.f32.xlu0 %v1679_v47  ;;  %616 = vmax.xlane.f32.xlu1 %v1683_v48 }
 0x272   : > { %618 = vmax.xlane.f32.xlu0 %v1689_v49  ;;  %620 = vmax.xlane.f32.xlu1 %v1693_v50 }
 0x276   : > { %622 = vmax.xlane.f32.xlu0 %v1699_v51  ;;  %624 = vmax.xlane.f32.xlu1 %v1703_v52 }
 0x27a   : > { %626 = vmax.xlane.f32.xlu0 %v1709_v53  ;;  %628 = vmax.xlane.f32.xlu1 %v1713_v54 }
 0x27e   : > { %630 = vmax.xlane.f32.xlu0 %v1719_v55  ;;  %632 = vmax.xlane.f32.xlu1 %v1723_v56 }
 0x282   : > { %634 = vmax.xlane.f32.xlu0 %v1729_v57  ;;  %636 = vmax.xlane.f32.xlu1 %v1733_v58 }
 0x2f3   : > { %v1737_v59 = vpop.xlane.xlu0 %606  ;;  %v1739_v60 = vpop.xlane.xlu1 %610 }
 0x2f4   : > { %v638_v61 = vsub.f32 %v1659_v43, %v1737_v59  ;;  %v640_v62 = vsub.f32 %v1663_v44, %v1739_v60 }
 0x2f6   : > { %v654_v63 = vmul.f32 1.442695, %v638_v61  ;;  %v658_v0 = vmul.f32 1.442695, %v640_v62 }
 0x2f7   : > { %v1745_v1 = vpop.xlane.xlu0 %608  ;;  %v1747_v2 = vpop.xlane.xlu1 %612 }
 0x2f8   : > { %1144 = vpow2.f32 %v654_v63  ;;  %v639_v3 = vsub.f32 %v1669_v45, %v1745_v1  ;;  %v641_v4 = vsub.f32 %v1673_v46, %v1747_v2 }
 0x2f9   : > { %1146 = vpow2.f32 %v658_v0 }
 0x2fa   : > { %v656_v5 = vmul.f32 1.442695, %v639_v3  ;;  %v660_v6 = vmul.f32 1.442695, %v641_v4 }
 0x2fb   : > { %v1753_v7 = vpop.xlane.xlu0 %614  ;;  %v1755_v8 = vpop.xlane.xlu1 %616 }
 0x2fc   : > { %1148 = vpow2.f32 %v656_v5  ;;  %v642_v9 = vsub.f32 %v1679_v47, %v1753_v7  ;;  %v643_v10 = vsub.f32 %v1683_v48, %v1755_v8 }
 0x2fd   : > { %1150 = vpow2.f32 %v660_v6 }
 0x2fe   : > { %v662_v11 = vmul.f32 1.442695, %v642_v9  ;;  %v664_v12 = vmul.f32 1.442695, %v643_v10 }
 0x2ff   : > { %v1761_v13 = vpop.xlane.xlu0 %618  ;;  %v1763_v14 = vpop.xlane.xlu1 %620 }
 0x300   : > { %1152 = vpow2.f32 %v662_v11  ;;  %v644_v15 = vsub.f32 %v1689_v49, %v1761_v13  ;;  %v645_v16 = vsub.f32 %v1693_v50, %v1763_v14 }
 0x301   : > { %1154 = vpow2.f32 %v664_v12 }
 0x302   : > { %v1145_v17 = vpop.eup %1144  ;;  %v666_v18 = vmul.f32 1.442695, %v644_v15  ;;  %v668_v19 = vmul.f32 1.442695, %v645_v16 }
 0x303   : > { %686 = vadd.xlane.f32.xlu0 %v1145_v17  ;;  %v1769_v20 = vpop.xlane.xlu0 %622  ;;  %v1771_v21 = vpop.xlane.xlu1 %624 }
 0x304   : > { %v1147_v22 = vpop.eup %1146  ;;  %1156 = vpow2.f32 %v666_v18  ;;  %v646_v23 = vsub.f32 %v1699_v51, %v1769_v20  ;;  %v647_v24 = vsub.f32 %v1703_v52, %v1771_v21 }
 0x305   : > { %1158 = vpow2.f32 %v668_v19 }
 0x306   : > { %v1149_v25 = vpop.eup %1148  ;;  %v670_v26 = vmul.f32 1.442695, %v646_v23  ;;  %v672_v27 = vmul.f32 1.442695, %v647_v24 }
 0x307   : > { %690 = vadd.xlane.f32.xlu0 %v1147_v22  ;;  %688 = vadd.xlane.f32.xlu1 %v1149_v25  ;;  %v1777_v28 = vpop.xlane.xlu0 %626  ;;  %v1779_v29 = vpop.xlane.xlu1 %628 }
 0x308   : > { %v1151_v30 = vpop.eup %1150  ;;  %1160 = vpow2.f32 %v670_v26  ;;  %v648_v31 = vsub.f32 %v1709_v53, %v1777_v28  ;;  %v649_v32 = vsub.f32 %v1713_v54, %v1779_v29 }
 0x309   : > { %1162 = vpow2.f32 %v672_v27 }
 0x30a   : > { %v1153_v33 = vpop.eup %1152  ;;  %v674_v34 = vmul.f32 1.442695, %v648_v31  ;;  %v676_v35 = vmul.f32 1.442695, %v649_v32 }
 0x30b   : > { %692 = vadd.xlane.f32.xlu1 %v1151_v30  ;;  %694 = vadd.xlane.f32.xlu0 %v1153_v33  ;;  %v1785_v36 = vpop.xlane.xlu0 %630  ;;  %v1787_v37 = vpop.xlane.xlu1 %632 }
 0x30c   : > { %v1155_v38 = vpop.eup %1154  ;;  %1164 = vpow2.f32 %v674_v34  ;;  %v650_v39 = vsub.f32 %v1719_v55, %v1785_v36  ;;  %v651_v40 = vsub.f32 %v1723_v56, %v1787_v37 }
 0x30d   : > { %1166 = vpow2.f32 %v676_v35 }
 0x30e   : > { %v1157_v41 = vpop.eup %1156  ;;  %v678_v42 = vmul.f32 1.442695, %v650_v39  ;;  %v680_v61 = vmul.f32 1.442695, %v651_v40 }
 0x30f   : > { %696 = vadd.xlane.f32.xlu1 %v1155_v38  ;;  %698 = vadd.xlane.f32.xlu0 %v1157_v41  ;;  %v1793_v62 = vpop.xlane.xlu0 %634  ;;  %v1795_v63 = vpop.xlane.xlu1 %636 }
 0x310   : > { %v1159_v0 = vpop.eup %1158  ;;  %1168 = vpow2.f32 %v678_v42  ;;  %v652_v3 = vsub.f32 %v1729_v57, %v1793_v62  ;;  %v653_v4 = vsub.f32 %v1733_v58, %v1795_v63 }
 0x311   : > { %1170 = vpow2.f32 %v680_v61 }
 0x312   : > { %v1161_v5 = vpop.eup %1160  ;;  %v682_v6 = vmul.f32 1.442695, %v652_v3  ;;  %v684_v9 = vmul.f32 1.442695, %v653_v4 }
 0x313   : > { %700 = vadd.xlane.f32.xlu1 %v1159_v0  ;;  %702 = vadd.xlane.f32.xlu0 %v1161_v5  ;;  %v1163_v10 = vpop.eup %1162 }
 0x314   : > { %1172 = vpow2.f32 %v682_v6 }
 0x315   : > { %1174 = vpow2.f32 %v684_v9 }
 0x316   : > { %v1165_v11 = vpop.eup %1164 }
 0x317   : > { %704 = vadd.xlane.f32.xlu1 %v1163_v10  ;;  %706 = vadd.xlane.f32.xlu0 %v1165_v11  ;;  %v1167_v12 = vpop.eup %1166 }
 0x31a   : > { %v1169_v15 = vpop.eup %1168 }
 0x31b   : > { %708 = vadd.xlane.f32.xlu1 %v1167_v12  ;;  %710 = vadd.xlane.f32.xlu0 %v1169_v15  ;;  %v1171_v16 = vpop.eup %1170 }
 0x31e   : > { %v1173_v17 = vpop.eup %1172 }
 0x31f   : > { %712 = vadd.xlane.f32.xlu1 %v1171_v16  ;;  %714 = vadd.xlane.f32.xlu0 %v1173_v17  ;;  %v1175_v18 = vpop.eup %1174 }
 0x323   : > { %716 = vadd.xlane.f32.xlu1 %v1175_v18 }
 0x390   : > { %v687_v19 = vpop.xlane.xlu0 %686 }
 0x391   : > { %1176 = vlog2.f32 %v687_v19 }
 0x394   : > { %v689_v22 = vpop.xlane.xlu1 %688  ;;  %v691_v23 = vpop.xlane.xlu0 %690 }
 0x395   : > { %1178 = vlog2.f32 %v689_v22 }
 0x396   : > { %1180 = vlog2.f32 %v691_v23 }
 0x398   : > { %v693_v24 = vpop.xlane.xlu1 %692  ;;  %v695_v25 = vpop.xlane.xlu0 %694 }
 0x399   : > { %1182 = vlog2.f32 %v693_v24 }
 0x39a   : > { %1184 = vlog2.f32 %v695_v25 }
 0x39b   : > { %v1177_v26 = vpop.eup %1176 }
 0x39c   : > { %v719_v27 = vmul.f32 0.6931472, %v1177_v26  ;;  %v697_v30 = vpop.xlane.xlu1 %696  ;;  %v699_v31 = vpop.xlane.xlu0 %698 }
 0x39d   : > { %1186 = vlog2.f32 %v697_v30 }
 0x39e   : > { %v750_v32 = vadd.f32 %v719_v27, %v1737_v59  ;;  %1188 = vlog2.f32 %v699_v31 }
 0x39f   : > { %v1179_v33 = vpop.eup %1178 }
 0x3a0   : > { %v1181_v34 = vpop.eup %1180  ;;  %v766_v35 = vsub.f32 %v1659_v43, %v750_v32  ;;  %v721_v38 = vmul.f32 0.6931472, %v1179_v33  ;;  %v701_v39 = vpop.xlane.xlu1 %700 }
 0x3a1   : > { %v703_v40 = vpop.xlane.xlu0 %702  ;;  %v723_v41 = vmul.f32 0.6931472, %v1181_v34  ;;  %1190 = vlog2.f32 %v701_v39 }
 0x3a2   : > { %782 = vst [vmem:[#allocation8] sm:$0xff] %v766_v35  ;;  %v751_v42 = vadd.f32 %v721_v38, %v1745_v1  ;;  %1192 = vlog2.f32 %v703_v40 }
 0x3a3   : > { %v1183_v61 = vpop.eup %1182  ;;  %v752_v0 = vadd.f32 %v723_v41, %v1739_v60 }
 0x3a4   : > { %v1185_v3 = vpop.eup %1184  ;;  %v767_v59 = vsub.f32 %v1669_v45, %v751_v42  ;;  %v725_v4 = vmul.f32 0.6931472, %v1183_v61  ;;  %v705_v5 = vpop.xlane.xlu1 %704 }
 0x3a5   : > { %v707_v6 = vpop.xlane.xlu0 %706  ;;  %v768_v43 = vsub.f32 %v1663_v44, %v752_v0  ;;  %v727_v9 = vmul.f32 0.6931472, %v1185_v3  ;;  %1194 = vlog2.f32 %v705_v5 }
 0x3a6   : > { %783 = vst [vmem:[#allocation8 + $0x8] sm:$0xff] %v767_v59  ;;  %v753_v10 = vadd.f32 %v725_v4, %v1747_v2  ;;  %1196 = vlog2.f32 %v707_v6 }
 0x3a7   : > { %v1187_v11 = vpop.eup %1186  ;;  %784 = vst [vmem:[#allocation8 + $0x10] sm:$0xff] %v768_v43  ;;  %v754_v1 = vadd.f32 %v727_v9, %v1753_v7 }
 0x3a8   : > { %v1189_v12 = vpop.eup %1188  ;;  %v769_v60 = vsub.f32 %v1673_v46, %v753_v10  ;;  %v729_v15 = vmul.f32 0.6931472, %v1187_v11  ;;  %v709_v45 = vpop.xlane.xlu1 %708 }
 0x3a9   : > { %v711_v16 = vpop.xlane.xlu0 %710  ;;  %v770_v17 = vsub.f32 %v1679_v47, %v754_v1  ;;  %v731_v18 = vmul.f32 0.6931472, %v1189_v12  ;;  %1198 = vlog2.f32 %v709_v45 }
 0x3aa   : > { %785 = vst [vmem:[#allocation8 + $0x18] sm:$0xff] %v769_v60  ;;  %v755_v44 = vadd.f32 %v729_v15, %v1755_v8  ;;  %1200 = vlog2.f32 %v711_v16 }
 0x3ab   : > { %v1191_v2 = vpop.eup %1190  ;;  %786 = vst [vmem:[#allocation8 + $0x20] sm:$0xff] %v770_v17  ;;  %v756_v19 = vadd.f32 %v731_v18, %v1761_v13 }
 0x3ac   : > { %v1193_v22 = vpop.eup %1192  ;;  %v771_v7 = vsub.f32 %v1683_v48, %v755_v44  ;;  %v733_v23 = vmul.f32 0.6931472, %v1191_v2  ;;  %v713_v46 = vpop.xlane.xlu1 %712 }
 0x3ad   : > { %v715_v24 = vpop.xlane.xlu0 %714  ;;  %v772_v25 = vsub.f32 %v1689_v49, %v756_v19  ;;  %v735_v26 = vmul.f32 0.6931472, %v1193_v22  ;;  %1202 = vlog2.f32 %v713_v46 }
 0x3ae   : > { %787 = vst [vmem:[#allocation8 + $0x28] sm:$0xff] %v771_v7  ;;  %v757_v47 = vadd.f32 %v733_v23, %v1763_v14  ;;  %1204 = vlog2.f32 %v715_v24 }
 0x3af   : > { %v1195_v8 = vpop.eup %1194  ;;  %788 = vst [vmem:[#allocation8 + $0x30] sm:$0xff] %v772_v25  ;;  %v758_v27 = vadd.f32 %v735_v26, %v1769_v20 }
 0x3b0   : > { %v1197_v30 = vpop.eup %1196  ;;  %v773_v13 = vsub.f32 %v1693_v50, %v757_v47  ;;  %v737_v31 = vmul.f32 0.6931472, %v1195_v8  ;;  %v717_v48 = vpop.xlane.xlu1 %716 }
 0x3b1   : > { %v774_v32 = vsub.f32 %v1699_v51, %v758_v27  ;;  %v739_v33 = vmul.f32 0.6931472, %v1197_v30  ;;  %1206 = vlog2.f32 %v717_v48 }
 0x3b2   : > { %789 = vst [vmem:[#allocation8 + $0x38] sm:$0xff] %v773_v13  ;;  %v759_v49 = vadd.f32 %v737_v31, %v1771_v21 }
 0x3b3   : > { %v1199_v34 = vpop.eup %1198  ;;  %790 = vst [vmem:[#allocation8 + $0x40] sm:$0xff] %v774_v32  ;;  %v760_v14 = vadd.f32 %v739_v33, %v1777_v28 }
 0x3b4   : > { %v1201_v35 = vpop.eup %1200  ;;  %v775_v38 = vsub.f32 %v1703_v52, %v759_v49  ;;  %v741_v20 = vmul.f32 0.6931472, %v1199_v34 }
 0x3b5   : > { %v776_v39 = vsub.f32 %v1709_v53, %v760_v14  ;;  %v743_v50 = vmul.f32 0.6931472, %v1201_v35 }
 0x3b6   : > { %791 = vst [vmem:[#allocation8 + $0x48] sm:$0xff] %v775_v38  ;;  %v761_v40 = vadd.f32 %v741_v20, %v1779_v29 }
 0x3b7   : > { %v1203_v51 = vpop.eup %1202  ;;  %792 = vst [vmem:[#allocation8 + $0x50] sm:$0xff] %v776_v39  ;;  %v762_v41 = vadd.f32 %v743_v50, %v1785_v36 }
 0x3b8   : > { %v1205_v42 = vpop.eup %1204  ;;  %v777_v21 = vsub.f32 %v1713_v54, %v761_v40  ;;  %v745_v61 = vmul.f32 0.6931472, %v1203_v51 }
 0x3b9   : > { %v778_v28 = vsub.f32 %v1719_v55, %v762_v41  ;;  %v747_v0 = vmul.f32 0.6931472, %v1205_v42 }
 0x3ba   : > { %793 = vst [vmem:[#allocation8 + $0x58] sm:$0xff] %v777_v21  ;;  %v763_v52 = vadd.f32 %v745_v61, %v1787_v37 }
 0x3bb   : > { %v1207_v3 = vpop.eup %1206  ;;  %794 = vst [vmem:[#allocation8 + $0x60] sm:$0xff] %v778_v28  ;;  %v764_v53 = vadd.f32 %v747_v0, %v1793_v62 }
 0x3bc   : > { %v779_v29 = vsub.f32 %v1723_v56, %v763_v52  ;;  %v749_v59 = vmul.f32 0.6931472, %v1207_v3 }
 0x3bd   : > { %v780_v4 = vsub.f32 %v1729_v57, %v764_v53 }
 0x3be   : > { %795 = vst [vmem:[#allocation8 + $0x68] sm:$0xff] %v779_v29  ;;  %v765_v36 = vadd.f32 %v749_v59, %v1795_v63 }
 0x3bf   : > { %796 = vst [vmem:[#allocation8 + $0x70] sm:$0xff] %v780_v4 }
 0x3c0   : > { %v781_v54 = vsub.f32 %v1733_v58, %v765_v36 }
 0x3c2   : > { %797 = vst [vmem:[#allocation8 + $0x78] sm:$0xff] %v781_v54 }
 0x3c3 PF: > { %p1835_p6 = scmp.eq.s32.totalorder %s925_s21, 2  ;;  %s1385_s6 = smov [#allocation8]  }
 0x3c4   : > { %s814_s13 = sshll.u32 %s1385_s6, 4  ;;  %s815_s13 = int_to_ptr.vmem [resolvable:$true] %s814_s13 }
 0x3c5   : > { %s1290_s15 = scalar_lea.vmem %s815_s13, 2048  ;;  %s1296_s8 = scalar_lea.vmem %s815_s13, 4096 }
 0x3c6   : > { %p1291_p8 = scmp.ne.s32.totalorder %s815_s13, %s1290_s15  ;;  %p1297_p13 = scmp.lt.s32.totalorder %s815_s13, %s815_s13 }
 0x3c7   : > { %p1298_p1 = scmp.lt.s32.totalorder %s1296_s8, %s1290_s15 }
 0x3c8   : > { %p1292_p11 = pnand %p1291_p8, %p1835_p6 }
 0x3c9   : > { %p1299_p2 = por %p1298_p1, %p1297_p13 }
 0x3ca   : > { %p1293_p7 = pneg %p1292_p11 }
 0x3cc   : > { %p1300_p3 = pnand %p1299_p2, %p1293_p7 }
 0x3ce   : > { %1303 = shalt.err (!%p1300_p3)
}
 0x3cf   : > { %s1304_s12 = scalar_lea.hbm %s1882_s4, 2048 }
 0x3d0   : > { %p1305_p12 = scmp.ne.s32.totalorder %s1882_s4, %s1304_s12  ;;  %p1310_p9 = scmp.lt.u32.totalorder %s1304_s12, %s1882_s4 }
 0x3d2   : > { %p1306_p0 = pnand %p1305_p12, %p1835_p6 }
 0x3d4   : > { %p1307_p4 = pneg %p1306_p0 }
 0x3d6   : > { %p1312_p5 = pnand %p1310_p9, %p1307_p4 }
 0x3d8   : > { %1315 = shalt.err (!%p1312_p5)
}
 0x3d9   : > { %s1386_s30 = smov 128   ;;  %s1387_s7 = smov 8  }
 0x3da   : > { %1066 = dma.vmem_to_hbm [thread:$0]  (%p1835_p6), %s815_s13, 2048, %s1882_s4, [#allocation7], %s1386_s30, %s1386_s30, %s1387_s7  }
 0x3db PF: > { %p1079_p10 = scmp.ge.s32.totalorder %s1378_s20, 2  ;;  %p1080_p8 = scmp.eq.s32.totalorder %s926_s22, 2 }
 0x3dd   : > { %p1074_p11 = pnand %p1080_p8, %p1079_p10 }
 0x3df   : > { %1353 = dma.done.wait (!%p1074_p11), [#allocation7], 2048  }
 0x3e0   : > { %1355 = vsyncadd (!%p1074_p11), [#allocation7], 4294965248  ;;  %s20_s20 = sadd.s32 1, %s1378_s20   ;;  %s1888_s15 = smov %s1362_s16 }
 0x3e1   : > { %p17_p7 = scmp.ge.s32.totalorder %s20_s20, 5   ;;  %s1889_s16 = smov %s1366_s17 }
 0x3e2   : > { %s1890_s17 = smov %s1466_s29  ;;  %s1891_s18 = smov %s1374_s19 }
 0x3e3   : > { %s1892_s19 = smov %s1894_s23  ;;  %19 = sbr.rel (!%p17_p7) target bundleno = 6 (0x6), region = 101 }
 0x3ea   :  { %835 = vsyncpa [#allocation6], 1 }
 0x3eb   :  { %837 = vsyncpa [#allocation6 + $0x1], 1 }
 0x3ec   :  { %838 = vsyncpa [#allocation7], 1 }
 0x3ed   :  { %840 = vsyncpa [#allocation7 + $0x1], 1 }
 0x3ee   :  { %841 = vsyncmov [#allocation3] }
 0x3f1   :  { %s842_s22 = vpop.sfrf %841 }
 0x3f2   :  { %p957_p6 = scmp.ne.s32.totalorder %s842_s22, 0 }
 0x3f4   :  { %846 = shalt.err (%p957_p6)  }
 0x3f5   :  { %848 = vsyncmov [#allocation3 + $0x1] }
 0x3f8   :  { %s849_s9 = vpop.sfrf %848 }
 0x3f9   :  { %p958_p13 = scmp.ne.s32.totalorder %s849_s9, 0 }
 0x3fb   :  { %853 = shalt.err (%p958_p13)  }

</bundles_post_ra>
